<compile_context>
chip_gen: v6e
topology: v6e:2x2x1
jax: 0.10.0
libtpu: 0.0.40
codegen_flags: <defaults>
</compile_context>

<pallas_src>
import math

import jax
import jax.numpy as jnp
from jax import lax
from jax.experimental import pallas as pl
from jax.experimental.pallas import tpu as pltpu

KH, KW = 10, 1  # fixed by the module: weight shape is (out_dim, in_dim, 10, 1)


def _pick_batch_tile(n, per_sample_bytes, target_bytes=2 << 20):
    """Largest divisor of n whose per-step block stays under target_bytes while
    keeping >= 2 grid steps (pipelining / v7x 2-TC sharding) whenever n >= 2."""
    cap = max(1, target_bytes // max(1, per_sample_bytes))
    min_steps = 2 if n >= 2 else 1
    tb = 1
    for d in range(1, n + 1):
        if n % d == 0 and d <= cap and n // d >= min_steps:
            tb = d
    return tb


def phd_conv2d_forward(inp, weight, bias, conv_table, stride,
                       compute_dtype=jnp.bfloat16):
    """inp: (N, C, 1, W) f32, weight: (O, C, 10, 1), bias: (O,),
    conv_table: int32 (Wp, Hp) with values in [0, W).  Returns (N, O, Ho, Wo) f32."""
    N, C, H, W = inp.shape
    assert H == 1, "module assumes input H == 1"
    O = weight.shape[0]
    Wp, Hp = conv_table.shape
    assert Hp >= KH, "gathered height must be >= kernel height (10)"
    Ho = (Hp - KH) // stride + 1
    Wo = (Wp - KW) // stride + 1
    HoWo = Ho * Wo
    K = KH * C

    # ---- single-gather wrapper glue: one jnp.take lands directly in the
    # kernel's layout (K = kh*C + c on sublanes, Ho*Wo on lanes) -------------
    kh = jnp.arange(KH, dtype=jnp.int32)
    q = jnp.arange(Ho, dtype=jnp.int32)
    wo = jnp.arange(Wo, dtype=jnp.int32)
    # conv_table[wo*stride, q*stride + kh]  -> W-index of tap kh at output (q, wo)
    col = conv_table[wo[None, None, :] * stride,
                     q[None, :, None] * stride + kh[:, None, None]]   # (KH, Ho, Wo)
    col = col.astype(jnp.int32).reshape(KH, 1, HoWo)
    c_off = (jnp.arange(C, dtype=jnp.int32) * W).reshape(1, C, 1)
    idx = (c_off + col).reshape(K, HoWo)                              # flat into C*W

    inp_flat = inp.reshape(N, C * W)                                  # H == 1
    xg = jnp.take(inp_flat, idx, axis=1).astype(compute_dtype)        # (N, K, HoWo)

    # weight (O, C, KH, 1) -> (O, K) with K index = kh*C + c (matches idx)
    w_flat = jnp.transpose(weight[:, :, :, 0], (0, 2, 1)).reshape(O, K)
    w_flat = w_flat.astype(compute_dtype)
    b_col = bias.reshape(O, 1).astype(jnp.float32)

    # ---- batch tiling ------------------------------------------------------
    itemsize = jnp.dtype(compute_dtype).itemsize
    per_sample_bytes = K * HoWo * itemsize + O * HoWo * 4
    TB = _pick_batch_tile(N, per_sample_bytes)
    NB = N // TB

    # ---- Pallas kernel: one K=KH*C MXU contraction per sample, lane-dense --
    def kernel(x_ref, w_ref, b_ref, o_ref):
        w = w_ref[...]                                   # (O, K), VMEM-resident
        b = b_ref[...]                                   # (O, 1) f32
        for tb in range(TB):                             # static unroll
            acc = jnp.dot(w, x_ref[tb],                  # (O,K)@(K,HoWo)->(O,HoWo)
                          preferred_element_type=jnp.float32)
            o_ref[tb] = jnp.maximum(acc + b, 0.0).astype(o_ref.dtype)
        # TODO(synk): for fixed O=8/C=4 a pure-VPU MAC formulation (lane-dense
        # HoWo, K=40 broadcast multiply-adds) can beat the tiny MXU pushes on
        # v5e; the single K=40 dot is kept for simplicity/portability.

    flops = 2 * N * O * K * HoWo
    bytes_accessed = (N * K * HoWo * itemsize      # streamed activations
                      + O * K * itemsize           # resident weights
                      + O * 4                      # bias
                      + N * O * HoWo * 4)          # lane-dense output writeback

    out = pl.pallas_call(
        kernel,
        out_shape=jax.ShapeDtypeStruct((N, O, HoWo), jnp.float32),
        grid=(NB,),
        in_specs=[
            # activations: TB samples per grid step, spatial dim on lanes
            pl.BlockSpec((TB, K, HoWo), lambda nb: (nb, 0, 0)),
            # TODO(synk): add pipeline_mode=pl.Buffered(3) here if xprof still
            # shows exposed DMA at production block sizes.
            # weights / bias: grid-invariant -> DMA'd once, stay resident
            pl.BlockSpec((O, K), lambda nb: (0, 0)),
            pl.BlockSpec((O, 1), lambda nb: (0, 0)),
        ],
        out_specs=pl.BlockSpec((TB, O, HoWo), lambda nb: (nb, 0, 0)),
        compiler_params=pltpu.CompilerParams(
            dimension_semantics=("parallel",),       # shard batch over TCs
            vmem_limit_bytes=48 * 1024 * 1024,       # <= v7x's 64 MiB VMEM
        ),
        cost_estimate=pl.CostEstimate(
            flops=flops, transcendentals=0, bytes_accessed=bytes_accessed),
    )(xg, w_flat, b_col)

    return out.reshape(N, O, Ho, Wo)                 # pure reshape, no transpose


if __name__ == "__main__":
    # Small shapes consistent with the module: division=0 -> W = 20
    N, in_dim, out_dim = 2, 4, 8
    H, W = 1, 20
    Hp, Wp = 12, 8  # conv_table has shape (Wp, Hp); conv_table.T -> (Hp, Wp)

    key = jax.random.PRNGKey(0)
    k_w, k_b, k_x = jax.random.split(key, 3)

    # kaiming_uniform(a=sqrt(5)) => bound = 1/sqrt(fan_in) for both weight & bias
    fan_in = in_dim * KH * KW
    bound = 1.0 / math.sqrt(fan_in)
    weight = jax.random.uniform(k_w, (out_dim, in_dim, KH, KW), jnp.float32, -bound, bound)
    bias = jax.random.uniform(k_b, (out_dim,), jnp.float32, -bound, bound)

    # Deterministic synthetic conv_table with indices into [0, W)
    conv_table = (jnp.arange(Wp, dtype=jnp.int32)[:, None] * 3
                  + jnp.arange(Hp, dtype=jnp.int32)[None, :] * 7) % W   # (Wp, Hp)

    x_in = jax.random.normal(k_x, (N, in_dim, H, W), jnp.float32)

    fwd = jax.jit(phd_conv2d_forward, static_argnames=("stride", "compute_dtype"))

    # Pure-JAX reference with the same bf16-rounded operands (the kernel
    # accumulates in f32, so residual diff is only accumulation order).
    xq = x_in.astype(jnp.bfloat16).astype(jnp.float32)
    wq = weight.astype(jnp.bfloat16).astype(jnp.float32)
    x_ref = jnp.squeeze(xq[..., conv_table.T], axis=2)

    for stride in (1, 2):
        out = fwd(x_in, weight, bias, conv_table, stride=stride)
        out = jax.block_until_ready(out)

        ref = lax.conv_general_dilated(
            x_ref, wq, window_strides=(stride, stride), padding="VALID",
            dimension_numbers=("NCHW", "OIHW", "NCHW"),
            precision=lax.Precision.HIGHEST)
        ref = jnp.maximum(ref + bias[None, :, None, None], 0.0)

        assert out.shape == ref.shape, (stride, out.shape, ref.shape)
        assert jnp.allclose(out, ref, rtol=1e-4, atol=1e-4), (
            stride, float(jnp.max(jnp.abs(out - ref))))

    print("KERNEL_OK")
</pallas_src>

<mosaic_0001>
module attributes {stable_mosaic.version = 11 : i64} {
  func.func @kernel(%arg0: i32, %arg1: memref<1x40x24xbf16, #tpu.memory_space<vmem>>, %arg2: memref<8x40xbf16, #tpu.memory_space<vmem>>, %arg3: memref<8x1xf32, #tpu.memory_space<vmem>>, %arg4: memref<1x8x24xf32, #tpu.memory_space<vmem>>) attributes {dimension_semantics = [#tpu.dimension_semantics<parallel>], iteration_bounds = array<i64: 2>, scalar_prefetch = 0 : i64, scratch_operands = 0 : i64, tpu.core_type = #tpu.core_type<tc>, window_params = [{transform_indices = @transform_0, window_bounds = array<i64: 1, 40, 24>}, {pipeline_mode = #tpu.pipeline_mode<synchronous>, transform_indices = @transform_1, window_bounds = array<i64: 8, 40>}, {pipeline_mode = #tpu.pipeline_mode<synchronous>, transform_indices = @transform_2, window_bounds = array<i64: 8, 1>}, {transform_indices = @transform_3, window_bounds = array<i64: 1, 8, 24>}]} {
    %c0 = arith.constant 0 : index
    %c0_0 = arith.constant 0 : index
    %0 = vector.load %arg2[%c0, %c0_0] : memref<8x40xbf16, #tpu.memory_space<vmem>>, vector<8x40xbf16>
    %c0_1 = arith.constant 0 : index
    %c0_2 = arith.constant 0 : index
    %1 = vector.load %arg3[%c0_1, %c0_2] : memref<8x1xf32, #tpu.memory_space<vmem>>, vector<8x1xf32>
    %c0_3 = arith.constant 0 : index
    %c0_4 = arith.constant 0 : index
    %c0_5 = arith.constant 0 : index
    %2 = vector.load %arg1[%c0_3, %c0_4, %c0_5] : memref<1x40x24xbf16, #tpu.memory_space<vmem>>, vector<1x40x24xbf16>
    %3 = vector.shape_cast %2 : vector<1x40x24xbf16> to vector<40x24xbf16>
    %cst = arith.constant dense<0.000000e+00> : vector<8x24xf32>
    %4 = tpu.matmul %0, %3, %cst {dimension_numbers = #tpu.dot_dimension_numbers<[1], [0], [0], [1], [0, 0, 1, 1], [], []>} : vector<8x40xbf16>, vector<40x24xbf16>, vector<8x24xf32> -> vector<8x24xf32>
    %5 = vector.broadcast %1 : vector<8x1xf32> to vector<8x24xf32>
    %6 = arith.addf %4, %5 : vector<8x24xf32>
    %cst_6 = arith.constant 0.000000e+00 : f32
    %7 = vector.broadcast %cst_6 : f32 to vector<8x24xf32>
    %8 = arith.maximumf %6, %7 : vector<8x24xf32>
    %c0_7 = arith.constant 0 : index
    %c0_8 = arith.constant 0 : index
    %c0_9 = arith.constant 0 : index
    %9 = vector.load %arg4[%c0_7, %c0_8, %c0_9] : memref<1x8x24xf32, #tpu.memory_space<vmem>>, vector<1x8x24xf32>
    %10 = vector.shape_cast %9 : vector<1x8x24xf32> to vector<8x24xf32>
    %11 = vector.shape_cast %8 : vector<8x24xf32> to vector<1x8x24xf32>
    tpu.vector_store %arg4[%c0_7, %c0_8, %c0_9], %11 {strides = array<i32>} : memref<1x8x24xf32, #tpu.memory_space<vmem>>, vector<1x8x24xf32>,
    return
  }
  func.func @transform_0(%arg0: i32) -> (i32, i32, i32) {
    %c0_i32 = arith.constant 0 : i32
    %c0_i32_0 = arith.constant 0 : i32
    %c0_i32_1 = arith.constant 0 : i32
    return %arg0, %c0_i32, %c0_i32_0 : i32, i32, i32
  }
  func.func @transform_1(%arg0: i32) -> (i32, i32) {
    %c0_i32 = arith.constant 0 : i32
    %c0_i32_0 = arith.constant 0 : i32
    %c0_i32_1 = arith.constant 0 : i32
    return %c0_i32, %c0_i32_0 : i32, i32
  }
  func.func @transform_2(%arg0: i32) -> (i32, i32) {
    %c0_i32 = arith.constant 0 : i32
    %c0_i32_0 = arith.constant 0 : i32
    %c0_i32_1 = arith.constant 0 : i32
    return %c0_i32, %c0_i32_0 : i32, i32
  }
  func.func @transform_3(%arg0: i32) -> (i32, i32, i32) {
    %c0_i32 = arith.constant 0 : i32
    %c0_i32_0 = arith.constant 0 : i32
    %c0_i32_1 = arith.constant 0 : i32
    return %arg0, %c0_i32, %c0_i32_0 : i32, i32, i32
  }
}

</mosaic_0001>

<bundles_post_ra>
// kernel: phd_conv2d_forward.1
= control target key start
LH: loop header
LB: loop body
LE: loop exit
PB: predicated region body
PF: predicated region fallthrough
CT: control target
= control target key end

     0   :  { %s375_s12 = smov 0   ;;  %s398_s0 = inlined_call_operand.vmem [shape: bf16[2,40,24], index: 0, kind: input, shape index: {}]   ;;  %s399_s1 = inlined_call_operand.vmem [shape: bf16[8,40], index: 1, kind: input, shape index: {}]   ;;  %s400_s2 = inlined_call_operand.vmem [shape: f32[8,1], index: 2, kind: input, shape index: {}]   ;;  %s401_s3 = inlined_call_operand.vmem [shape: f32[2,8,24], index: 3, kind: output, shape index: {}]  }
   0x1 LB: > { %s301_s13 = sadd.s32 4294967295, %s350_s12   ;;  %p305_p0 = scmp.ge.s32.totalorder %s350_s12, 1  ;;  %s350_s12 = sphi %s375_s12, %s13_s12  }
   0x2   : > { %p137_p1 = scmp.lt.s32.totalorder %s350_s12, 3 }
   0x4   : > { %p138_p2 = pnand %p305_p0, %p137_p1 }
   0x5   : > { %p160_p3 = scmp.lt.s32.totalorder (!%p138_p2), %s301_s13, 1 }
   0x6   : > { %141 = sbr.rel (%p138_p2) target bundleno = 227 (0xe3), region = 32 }
   0xb   : > { %v352_v0 = vmov 0.0   ;;  %vm353_vm0 = vmmov 0   ;;  %v171_v1 = vld [vmem:[%s400_s2] sm:$0xff]  ;;  %s403_s13 = smov (!%p160_p3, %s301_s13), 1  ;;  %v354_v2 = vmov 0   ;;  %vm201_vm1 = vcmask 1043456  }
   0xc   : > { %318 = vmatprep.subr.bf16.mxu0 %v352_v0  ;;  %324 = vmatprep.mubr.msk.bf16.mxu0 %vm353_vm0, %v352_v0  ;;  %s328_s16 = smul.u32 20, %s403_s13  ;;  %v170_v7 = vld [vmem:[%s399_s1] sm:$0xf]  ;;  %vm197_vm2 = vcmask 326656   ;;  %s307_s22 = sshll.u32 %s403_s13, 3  ;;  %vm246_vm3 = vcmask 195584  }
   0xd   : > { %340 = vset.pattern.permute.xlu0 %v354_v2  ;;  %s168_s25 = scalar_lea.vmem %s401_s3, %s307_s22 }
   0xe   : > { %179 = vperm.xlu0 %340, %v171_v1   ;;  %s164_s19 = scalar_lea.vmem %s398_s0, %s328_s16 }
   0xf   : > { %v341_v3 = vld [vmem:[%s164_s19 + $0x10] ss:$0 sps:$4 sm:$0xff]   ;;  %v342_v5 = vld [vmem:[%s164_s19 + $0x8] sm:$0xff]   ;;  %v343_v6 = vld [vmem:[%s164_s19] sm:$0xff]  }
  0x10   : > { %v203_v4 = vsel %vm201_vm1, %v341_v3, 0 }
  0x11   : > { %319 = vmatpush3.bf16.msra.mxu0 %v203_v4 }
  0x12   : > { %320 = vmatprep.subr.bf16.mxu0 %v352_v0 }
  0x15   : > { %321 = vmatpush3.bf16.msra.mxu0 %v342_v5 }
  0x16   : > { %322 = vmatprep.subr.bf16.mxu0 %v352_v0 }
  0x19   : > { %323 = vmatpush3.bf16.msra.mxu0 %v343_v6 }
  0x1c   : > { %325 = vmatmul.mubr.msk.bf16.vlgmr.msra.gmra.mxu0 %vm197_vm2, %v170_v7 }
  0x89   : > { %v180_v8 = vpop.permute.xlu0 %179 }
  0xdc   : > { %v239_v9 = vpop.f32.mrf.mxu0 }
  0xdd   : > { %v240_v10 = vadd.f32 %v239_v9, %v180_v8 }
  0xde   : > { %v326_v11 = vpop.f32.mrf.mxu0 }
  0xdf   : > { %v245_v12 = vmax.f32 %v240_v10, 0.0 }
  0xe0   : > { %v242_v13 = vpop.f32.mrf.mxu0 }
  0xe1   : > { %247 = vst.msk [vmem:[%s168_s25] sm:$0xff] %vm246_vm3, %v245_v12 }
  0xe2   : > { %v327_v14 = vpop.f32.mrf.mxu0 }
  0xe3 PF: > { %s13_s12 = sadd.s32 1, %s350_s12  }
  0xe4   : > { %p10_p4 = scmp.ge.s32.totalorder %s13_s12, 4  }
  0xe6   :  { %12 = sbr.rel (!%p10_p4) target bundleno = 1 (0x1), region = 62 }

</bundles_post_ra>
